<compile_context>
chip_gen: v6e
topology: v6e:2x2x1
jax: 0.10.0
libtpu: 0.0.40
codegen_flags: <defaults>
</compile_context>

<pallas_src>
import functools

import jax
import jax.numpy as jnp
from jax import lax
from jax.experimental import pallas as pl
from jax.experimental.pallas import tpu as pltpu


def _round_up(n, m):
    return ((n + m - 1) // m) * m


def _pick_tile(n, cap):
    """Largest sublane-aligned tile <= cap that divides n (falls back to n)."""
    for cand in (1024, 512, 256, 128, 64, 32, 16, 8):
        if cand <= cap and cand <= n and n % cand == 0:
            return cand
    return n


def _default_exp_dtype():
    """bf16 exp on chips with a bf16 EUP path (v6e/v7x); f32 on v5e and older."""
    try:
        kind = jax.devices()[0].device_kind.lower()
    except Exception:
        return jnp.float32
    if any(tag in kind for tag in ("v2", "v3", "v4", "v5")):
        return jnp.float32
    return jnp.bfloat16


# ---------------------------------------------------------------------------
# Pass 1: Q/K/V projections (computed once over the whole sequence).
# ---------------------------------------------------------------------------
def _qkv_proj_kernel(x_ref, wq_ref, wk_ref, wv_ref, q_ref, k_ref, v_ref, *,
                     compute_dtype, scale):
    xc = x_ref[...].astype(compute_dtype)
    q = jnp.dot(xc, wq_ref[...].astype(compute_dtype),
                preferred_element_type=jnp.float32)
    # Fold 1/sqrt(d_out) into Q once (perf feedback).
    q_ref[...] = (q * scale).astype(q_ref.dtype)
    k_ref[...] = jnp.dot(xc, wk_ref[...].astype(compute_dtype),
                         preferred_element_type=jnp.float32).astype(k_ref.dtype)
    v_ref[...] = jnp.dot(xc, wv_ref[...].astype(compute_dtype),
                         preferred_element_type=jnp.float32).astype(v_ref.dtype)


# ---------------------------------------------------------------------------
# Pass 2: flash attention over a (q tile, kv tile) grid with online softmax.
# ---------------------------------------------------------------------------
def _flash_kernel(q_ref, k_ref, v_ref, o_ref, m_scr, l_scr, acc_scr, *,
                  compute_dtype, exp_dtype):
    j = pl.program_id(1)

    @pl.when(j == 0)
    def _init():
        m_scr[...] = jnp.full_like(m_scr, -jnp.inf)
        l_scr[...] = jnp.zeros_like(l_scr)
        acc_scr[...] = jnp.zeros_like(acc_scr)

    # scores = (Q * scale) @ K^T, transpose folded into the MXU operand feed.
    s = lax.dot_general(q_ref[...], k_ref[...],
                        dimension_numbers=(((1,), (1,)), ((), ())),
                        preferred_element_type=jnp.float32)

    # Online-softmax update: running stats in f32, exp optionally in bf16.
    m_prev = m_scr[...]
    m_new = jnp.maximum(m_prev, jnp.max(s, axis=-1, keepdims=True))
    alpha = jnp.exp(m_prev - m_new)
    p = jnp.exp((s - m_new).astype(exp_dtype))
    l_scr[...] = alpha * l_scr[...] + jnp.sum(
        p.astype(jnp.float32), axis=-1, keepdims=True)
    acc_scr[...] = alpha * acc_scr[...] + jnp.dot(
        p.astype(compute_dtype), v_ref[...],
        preferred_element_type=jnp.float32)
    m_scr[...] = m_new

    @pl.when(j == pl.num_programs(1) - 1)
    def _finalize():
        inv_l = pl.reciprocal(l_scr[...], approx=True)  # EUP vrcp (free slot)
        o_ref[...] = (acc_scr[...] * inv_l).astype(o_ref.dtype)


def self_attention(x, w_query, w_key, w_value, *, tq=None, tkv=None,
                   compute_dtype=None, exp_dtype=None):
    """Pallas TPU forward pass of the SelfAttention module."""
    seq, d_in = x.shape
    d_out = w_query.shape[1]
    assert w_key.shape == (d_in, d_out) and w_value.shape == (d_in, d_out)

    # Precision policy: bf16 MXU operands by default (f32 matmuls decompose
    # into multiple bf16 passes on the MXU), f32 accumulation, f32 softmax
    # stats. NOTE: bf16 compute + approx reciprocal trade a little precision
    # for speed; pass compute_dtype=jnp.float32 / exp_dtype=jnp.float32 for a
    # near-exact path.
    if compute_dtype is None:
        compute_dtype = jnp.bfloat16
    if exp_dtype is None:
        exp_dtype = _default_exp_dtype()

    # Lane-dense head dim: zero-pad d_out to a multiple of 128 (zero columns
    # change neither Q K^T nor attn@V); padded output columns are sliced off.
    d_pad = _round_up(d_out, 128)
    pad = d_pad - d_out
    wq = jnp.pad(w_query, ((0, 0), (0, pad))) if pad else w_query
    wk = jnp.pad(w_key, ((0, 0), (0, pad))) if pad else w_key
    wv = jnp.pad(w_value, ((0, 0), (0, pad))) if pad else w_value

    # Large sequence tiles: per-grid-step overhead is ~0.35us, and >=256-wide
    # kv/q tiles fill the 256-wide MXU on v6e/v7x. VMEM footprint at 512x512
    # with d_pad=128 is only a few MiB (fits v7x's 64 MiB with big margin).
    if tq is None:
        tq = _pick_tile(seq, 512)
    if tkv is None:
        tkv = _pick_tile(seq, 512)
    assert seq % tq == 0 and seq % tkv == 0, "seq must be divisible by tiles"
    n_q, n_kv = seq // tq, seq // tkv

    # torch: attention_score / key.shape[-1] ** 0.5  (logical d_out, not padded)
    scale = 1.0 / float(d_out) ** 0.5

    qkv_dtype = jnp.dtype(compute_dtype)
    out_dtype = x.dtype

    # ---- Pass 1: Q/K/V projections (once, not per q tile). ----
    t_proj = _pick_tile(seq, 512)
    proj_cost = pl.CostEstimate(
        flops=int(2 * seq * d_in * d_pad * 3),
        transcendentals=0,
        bytes_accessed=int(x.dtype.itemsize * seq * d_in
                           + wq.dtype.itemsize * 3 * d_in * d_pad
                           + qkv_dtype.itemsize * 3 * seq * d_pad),
    )
    q, k, v = pl.pallas_call(
        functools.partial(_qkv_proj_kernel, compute_dtype=compute_dtype,
                          scale=scale),
        out_shape=[jax.ShapeDtypeStruct((seq, d_pad), qkv_dtype)] * 3,
        grid_spec=pltpu.PrefetchScalarGridSpec(
            num_scalar_prefetch=0,
            grid=(seq // t_proj,),
            in_specs=[
                pl.BlockSpec((t_proj, d_in), lambda i: (i, 0)),   # x tile
                pl.BlockSpec((d_in, d_pad), lambda i: (0, 0)),    # W_q (resident)
                pl.BlockSpec((d_in, d_pad), lambda i: (0, 0)),    # W_k (resident)
                pl.BlockSpec((d_in, d_pad), lambda i: (0, 0)),    # W_v (resident)
            ],
            out_specs=[pl.BlockSpec((t_proj, d_pad), lambda i: (i, 0))] * 3,
        ),
        compiler_params=pltpu.CompilerParams(
            dimension_semantics=("parallel",)),
        cost_estimate=proj_cost,
    )(x, wq, wk, wv)

    # ---- Pass 2: flash attention. ----
    flash_cost = pl.CostEstimate(
        flops=int(2 * seq * seq * d_pad * 2),            # QK^T + PV
        transcendentals=int(seq * seq),
        bytes_accessed=int(qkv_dtype.itemsize * (seq * d_pad            # Q
                                                 + 2 * n_q * seq * d_pad)  # K,V re-read per q tile
                           + jnp.dtype(out_dtype).itemsize * seq * d_pad),
    )
    out_padded = pl.pallas_call(
        functools.partial(_flash_kernel, compute_dtype=compute_dtype,
                          exp_dtype=exp_dtype),
        out_shape=jax.ShapeDtypeStruct((seq, d_pad), out_dtype),
        grid_spec=pltpu.PrefetchScalarGridSpec(
            num_scalar_prefetch=0,
            grid=(n_q, n_kv),
            in_specs=[
                pl.BlockSpec((tq, d_pad), lambda i, j: (i, 0)),   # Q tile (resident over kv sweep)
                pl.BlockSpec((tkv, d_pad), lambda i, j: (j, 0)),  # K tile
                pl.BlockSpec((tkv, d_pad), lambda i, j: (j, 0)),  # V tile
            ],
            out_specs=pl.BlockSpec((tq, d_pad), lambda i, j: (i, 0)),
            scratch_shapes=[
                pltpu.VMEM((tq, 1), jnp.float32),      # running max m
                pltpu.VMEM((tq, 1), jnp.float32),      # running denom l
                pltpu.VMEM((tq, d_pad), jnp.float32),  # output accumulator
            ],
        ),
        compiler_params=pltpu.CompilerParams(
            dimension_semantics=("parallel", "arbitrary")),
        cost_estimate=flash_cost,
    )(q, k, v)

    return out_padded[:, :d_out]


def self_attention_ref(x, w_query, w_key, w_value):
    q = x @ w_query
    k = x @ w_key
    v = x @ w_value
    scores = q @ k.T
    attn = jax.nn.softmax(scores / jnp.sqrt(jnp.float32(k.shape[-1])), axis=-1)
    return attn @ v


if __name__ == "__main__":
    key = jax.random.PRNGKey(0)
    kx, kq, kk, kv, kx2 = jax.random.split(key, 5)

    # Module-implied shapes: torch.rand-style uniform [0,1) parameters,
    # row_size = d_in = 32, column_size = d_out = 32, small seq = 8.
    seq, row_size, column_size = 8, 32, 32
    x = jax.random.uniform(kx, (seq, row_size), dtype=jnp.float32)
    w_query = jax.random.uniform(kq, (row_size, column_size), dtype=jnp.float32)
    w_key = jax.random.uniform(kk, (row_size, column_size), dtype=jnp.float32)
    w_value = jax.random.uniform(kv, (row_size, column_size), dtype=jnp.float32)

    # Case 1: full-precision MXU path (f32 compute / f32 exp) on the raw
    # uniform-[0,1) inputs (very sharp softmax), checked tightly.
    out = jax.block_until_ready(
        self_attention(x, w_query, w_key, w_value,
                       compute_dtype=jnp.float32, exp_dtype=jnp.float32))
    ref = self_attention_ref(x, w_query, w_key, w_value)
    assert out.shape == (seq, column_size)
    assert jnp.allclose(out, ref, rtol=1e-2, atol=1e-2), "f32-path mismatch vs reference"

    # Case 2: default performance path (bf16 MXU operands, auto exp dtype,
    # large tiles) on well-conditioned inputs, exercising the (n_q, n_kv)
    # flash grid and the online softmax across kv tiles.
    seq2 = 1024
    x2 = 0.3 * jax.random.normal(kx2, (seq2, row_size), dtype=jnp.float32)
    out2 = jax.block_until_ready(self_attention(x2, w_query, w_key, w_value))
    ref2 = self_attention_ref(x2, w_query, w_key, w_value)
    assert out2.shape == (seq2, column_size)
    assert jnp.allclose(out2, ref2, rtol=2e-2, atol=2e-2), "bf16-path mismatch vs reference"

    print("KERNEL_OK")
</pallas_src>

<mosaic_0001>
module attributes {stable_mosaic.version = 11 : i64} {
  func.func @_qkv_proj_kernel(%arg0: i32, %arg1: memref<8x32xf32, #tpu.memory_space<vmem>>, %arg2: memref<32x128xf32, #tpu.memory_space<vmem>>, %arg3: memref<32x128xf32, #tpu.memory_space<vmem>>, %arg4: memref<32x128xf32, #tpu.memory_space<vmem>>, %arg5: memref<8x128xf32, #tpu.memory_space<vmem>>, %arg6: memref<8x128xf32, #tpu.memory_space<vmem>>, %arg7: memref<8x128xf32, #tpu.memory_space<vmem>>) attributes {dimension_semantics = [#tpu.dimension_semantics<parallel>], iteration_bounds = array<i64: 1>, scalar_prefetch = 0 : i64, scratch_operands = 0 : i64, tpu.core_type = #tpu.core_type<tc>, window_params = [{transform_indices = @transform_0, window_bounds = array<i64: 8, 32>}, {pipeline_mode = #tpu.pipeline_mode<synchronous>, transform_indices = @transform_1, window_bounds = array<i64: 32, 128>}, {pipeline_mode = #tpu.pipeline_mode<synchronous>, transform_indices = @transform_2, window_bounds = array<i64: 32, 128>}, {pipeline_mode = #tpu.pipeline_mode<synchronous>, transform_indices = @transform_3, window_bounds = array<i64: 32, 128>}, {transform_indices = @transform_4, window_bounds = array<i64: 8, 128>}, {transform_indices = @transform_5, window_bounds = array<i64: 8, 128>}, {transform_indices = @transform_6, window_bounds = array<i64: 8, 128>}]} {
    %c0 = arith.constant 0 : index
    %c0_0 = arith.constant 0 : index
    %0 = vector.load %arg1[%c0, %c0_0] : memref<8x32xf32, #tpu.memory_space<vmem>>, vector<8x32xf32>
    %c0_1 = arith.constant 0 : index
    %c0_2 = arith.constant 0 : index
    %1 = vector.load %arg2[%c0_1, %c0_2] : memref<32x128xf32, #tpu.memory_space<vmem>>, vector<32x128xf32>
    %cst = arith.constant dense<0.000000e+00> : vector<8x128xf32>
    %2 = tpu.matmul %0, %1, %cst {dimension_numbers = #tpu.dot_dimension_numbers<[1], [0], [0], [1], [0, 0, 1, 1], [], []>} : vector<8x32xf32>, vector<32x128xf32>, vector<8x128xf32> -> vector<8x128xf32>
    %cst_3 = arith.constant 0.176776692 : f32
    %3 = vector.broadcast %cst_3 : f32 to vector<8x128xf32>
    %4 = arith.mulf %2, %3 : vector<8x128xf32>
    %c0_4 = arith.constant 0 : index
    %c0_5 = arith.constant 0 : index
    %5 = vector.load %arg5[%c0_4, %c0_5] : memref<8x128xf32, #tpu.memory_space<vmem>>, vector<8x128xf32>
    tpu.vector_store %arg5[%c0_4, %c0_5], %4 {strides = array<i32>} : memref<8x128xf32, #tpu.memory_space<vmem>>, vector<8x128xf32>,
    %c0_6 = arith.constant 0 : index
    %c0_7 = arith.constant 0 : index
    %6 = vector.load %arg3[%c0_6, %c0_7] : memref<32x128xf32, #tpu.memory_space<vmem>>, vector<32x128xf32>
    %cst_8 = arith.constant dense<0.000000e+00> : vector<8x128xf32>
    %7 = tpu.matmul %0, %6, %cst_8 {dimension_numbers = #tpu.dot_dimension_numbers<[1], [0], [0], [1], [0, 0, 1, 1], [], []>} : vector<8x32xf32>, vector<32x128xf32>, vector<8x128xf32> -> vector<8x128xf32>
    %c0_9 = arith.constant 0 : index
    %c0_10 = arith.constant 0 : index
    %8 = vector.load %arg6[%c0_9, %c0_10] : memref<8x128xf32, #tpu.memory_space<vmem>>, vector<8x128xf32>
    tpu.vector_store %arg6[%c0_9, %c0_10], %7 {strides = array<i32>} : memref<8x128xf32, #tpu.memory_space<vmem>>, vector<8x128xf32>,
    %c0_11 = arith.constant 0 : index
    %c0_12 = arith.constant 0 : index
    %9 = vector.load %arg4[%c0_11, %c0_12] : memref<32x128xf32, #tpu.memory_space<vmem>>, vector<32x128xf32>
    %cst_13 = arith.constant dense<0.000000e+00> : vector<8x128xf32>
    %10 = tpu.matmul %0, %9, %cst_13 {dimension_numbers = #tpu.dot_dimension_numbers<[1], [0], [0], [1], [0, 0, 1, 1], [], []>} : vector<8x32xf32>, vector<32x128xf32>, vector<8x128xf32> -> vector<8x128xf32>
    %c0_14 = arith.constant 0 : index
    %c0_15 = arith.constant 0 : index
    %11 = vector.load %arg7[%c0_14, %c0_15] : memref<8x128xf32, #tpu.memory_space<vmem>>, vector<8x128xf32>
    tpu.vector_store %arg7[%c0_14, %c0_15], %10 {strides = array<i32>} : memref<8x128xf32, #tpu.memory_space<vmem>>, vector<8x128xf32>,
    return
  }
  func.func @transform_0(%arg0: i32) -> (i32, i32) {
    %c0_i32 = arith.constant 0 : i32
    %c0_i32_0 = arith.constant 0 : i32
    return %arg0, %c0_i32 : i32, i32
  }
  func.func @transform_1(%arg0: i32) -> (i32, i32) {
    %c0_i32 = arith.constant 0 : i32
    %c0_i32_0 = arith.constant 0 : i32
    %c0_i32_1 = arith.constant 0 : i32
    return %c0_i32, %c0_i32_0 : i32, i32
  }
  func.func @transform_2(%arg0: i32) -> (i32, i32) {
    %c0_i32 = arith.constant 0 : i32
    %c0_i32_0 = arith.constant 0 : i32
    %c0_i32_1 = arith.constant 0 : i32
    return %c0_i32, %c0_i32_0 : i32, i32
  }
  func.func @transform_3(%arg0: i32) -> (i32, i32) {
    %c0_i32 = arith.constant 0 : i32
    %c0_i32_0 = arith.constant 0 : i32
    %c0_i32_1 = arith.constant 0 : i32
    return %c0_i32, %c0_i32_0 : i32, i32
  }
  func.func @transform_4(%arg0: i32) -> (i32, i32) {
    %c0_i32 = arith.constant 0 : i32
    %c0_i32_0 = arith.constant 0 : i32
    return %arg0, %c0_i32 : i32, i32
  }
  func.func @transform_5(%arg0: i32) -> (i32, i32) {
    %c0_i32 = arith.constant 0 : i32
    %c0_i32_0 = arith.constant 0 : i32
    return %arg0, %c0_i32 : i32, i32
  }
  func.func @transform_6(%arg0: i32) -> (i32, i32) {
    %c0_i32 = arith.constant 0 : i32
    %c0_i32_0 = arith.constant 0 : i32
    return %arg0, %c0_i32 : i32, i32
  }
}

</mosaic_0001>

<bundles_post_ra>
// kernel: tpu_custom_call.1
= control target key start
LH: loop header
LB: loop body
LE: loop exit
PB: predicated region body
PF: predicated region fallthrough
CT: control target
= control target key end

     0   :  { %12 = vsyncpa [#allocation3], 0  ;;  %s644_s0 = inlined_call_operand.hbm [shape: f32[8,32], index: 0, kind: input, shape index: {}]   ;;  %s645_s1 = inlined_call_operand.hbm [shape: f32[32,128], index: 1, kind: input, shape index: {}]   ;;  %s646_s2 = inlined_call_operand.hbm [shape: f32[32,128], index: 2, kind: input, shape index: {}]   ;;  %s647_s3 = inlined_call_operand.hbm [shape: f32[32,128], index: 3, kind: input, shape index: {}]   ;;  %s648_s4 = inlined_call_operand.hbm [shape: f32[8,128], index: 4, kind: output, shape index: {0}]   ;;  %s649_s5 = inlined_call_operand.hbm [shape: f32[8,128], index: 5, kind: output, shape index: {1}]   ;;  %s650_s6 = inlined_call_operand.hbm [shape: f32[8,128], index: 6, kind: output, shape index: {2}]  }
   0x1   :  { %13 = vsyncpa [#allocation6], 0 }
   0x2   :  { %14 = vsyncpa [#allocation9], 0 }
   0x3   :  { %15 = vsyncpa [#allocation4], 0 }
   0x4   :  { %16 = vsyncpa [#allocation12], 0  ;;  %s562_s21 = smov [#allocation5]  }
   0x5   :  { %s32_s22 = sshll.u32 %s562_s21, 4  ;;  %s33_s22 = int_to_ptr.vmem [resolvable:$true] %s32_s22 }
   0x6   :  { %s420_s23 = scalar_lea.vmem %s33_s22, 512  ;;  %p425_p1 = scmp.lt.s32.totalorder %s33_s22, %s33_s22 }
   0x7   :  { %p421_p0 = scmp.ne.s32.totalorder %s33_s22, %s420_s23  ;;  %p426_p2 = scmp.lt.s32.totalorder %s420_s23, %s420_s23 }
   0x9   :  { %p427_p3 = por %p426_p2, %p425_p1 }
   0xb   :  { %p428_p4 = pnand %p427_p3, %p421_p0 }
   0xd   :  { %431 = shalt.err (!%p428_p4)
}
   0xe   :  { %s563_s24 = smov 128   ;;  %s564_s25 = smov 8  }
   0xf   :  { %38 = dma.hbm_to_vmem [thread:$0]  %s645_s1, 512, %s33_s22, [#allocation6], %s563_s24, %s563_s24, %s564_s25  }
  0x10   :  { %s565_s28 = smov [#allocation2]   ;;  %s566_s30 = smov [#allocation7]  }
  0x11   :  { %s23_s29 = sshll.u32 %s565_s28, 4  ;;  %s44_s7 = sshll.u32 %s566_s30, 4  ;;  %s24_s29 = int_to_ptr.vmem [resolvable:$true] %s23_s29  ;;  %s45_s7 = int_to_ptr.vmem [resolvable:$true] %s44_s7 }
  0x12   :  { %s440_s8 = scalar_lea.vmem %s24_s29, 128  ;;  %p445_p6 = scmp.lt.s32.totalorder %s24_s29, %s24_s29 }
  0x13   :  { %p441_p5 = scmp.ne.s32.totalorder %s24_s29, %s440_s8  ;;  %p446_p7 = scmp.lt.s32.totalorder %s440_s8, %s440_s8 }
  0x15   :  { %p447_p8 = por %p446_p7, %p445_p6 }
  0x17   :  { %p448_p9 = pnand %p447_p8, %p441_p5 }
  0x19   :  { %451 = shalt.err (!%p448_p9)
}
  0x1a   :  { %26 = dma.hbm_to_vmem [thread:$0]  %s644_s0, 128, %s24_s29, [#allocation3]  }
  0x1b   :  { %s460_s11 = scalar_lea.vmem %s45_s7, 512  ;;  %p465_p11 = scmp.lt.s32.totalorder %s45_s7, %s45_s7 }
  0x1c   :  { %p461_p10 = scmp.ne.s32.totalorder %s45_s7, %s460_s11  ;;  %p466_p12 = scmp.lt.s32.totalorder %s460_s11, %s460_s11 }
  0x1e   :  { %p467_p13 = por %p466_p12, %p465_p11 }
  0x20   :  { %p468_p0 = pnand %p467_p13, %p461_p10 }
  0x22   :  { %471 = shalt.err (!%p468_p0)
}
  0x23   :  { %50 = dma.hbm_to_vmem [thread:$0]  %s646_s2, 512, %s45_s7, [#allocation6], %s563_s24, %s563_s24, %s564_s25  }
  0x24   :  { %s567_s13 = smov [#allocation8]  }
  0x25   :  { %s56_s14 = sshll.u32 %s567_s13, 4  ;;  %s57_s14 = int_to_ptr.vmem [resolvable:$true] %s56_s14 }
  0x26   :  { %s480_s15 = scalar_lea.vmem %s57_s14, 512  ;;  %p485_p2 = scmp.lt.s32.totalorder %s57_s14, %s57_s14 }
  0x27   :  { %p481_p1 = scmp.ne.s32.totalorder %s57_s14, %s480_s15  ;;  %p486_p3 = scmp.lt.s32.totalorder %s480_s15, %s480_s15 }
  0x29   :  { %p487_p4 = por %p486_p3, %p485_p2 }
  0x2b   :  { %p488_p5 = pnand %p487_p4, %p481_p1 }
  0x2d   :  { %491 = shalt.err (!%p488_p5)
}
  0x2e   :  { %62 = dma.hbm_to_vmem [thread:$0]  %s647_s3, 512, %s57_s14, [#allocation9], %s563_s24, %s563_s24, %s564_s25  }
  0x2f   :  { %552 = dma.done.wait [#allocation3], 128  }
  0x30   :  { %553 = vsyncadd [#allocation3], 4294967168 }
  0x31   :  { %554 = dma.done.wait [#allocation6], 1024  }
  0x32   :  { %555 = vsyncadd [#allocation6], 4294966272 }
  0x33   :  { %556 = dma.done.wait [#allocation9], 512  }
  0x34   :  { %557 = vsyncadd [#allocation9], 4294966784  ;;  %v568_v0 = vmov 0.0   ;;  %vm569_vm0 = vmmov 0   ;;  %v79_v1 = vld [vmem:[#allocation5 + $0x18] sm:$0xff]  ;;  %v78_v2 = vld [vmem:[#allocation5 + $0x10] sm:$0xff] }
  0x35   :  { %368 = vmatprep.subr.mxu0 %v568_v0  ;;  %379 = vmatprep.subr.mxu1 %v568_v0  ;;  %v159_v3 = vld [vmem:[#allocation7 + $0x18] sm:$0xff]  ;;  %v77_v4 = vld [vmem:[#allocation5 + $0x8] sm:$0xff]  ;;  %v158_v5 = vld [vmem:[#allocation7 + $0x10] sm:$0xff]  ;;  %vm80_vm1 = vcmask 261120   ;;  %s570_s2 = smov [#allocation11]   ;;  %s571_s17 = smov [#allocation10]  }
  0x36   :  { %376 = vmatprep.mubr.msk.f32.mxu0 %vm569_vm0, %v568_v0  ;;  %387 = vmatprep.mubr.msk.f32.mxu1 %vm569_vm0, %v568_v0  ;;  %v157_v6 = vld [vmem:[#allocation7 + $0x8] sm:$0xff]  ;;  %v76_v7 = vld [vmem:[#allocation5] sm:$0xff]  ;;  %v75_v8 = vld [vmem:[#allocation2] sm:$0xff]  ;;  %s322_s3 = sshll.u32 %s570_s2, 4  ;;  %s312_s18 = sshll.u32 %s571_s17, 4  ;;  %s323_s3 = int_to_ptr.vmem [resolvable:$true] %s322_s3  ;;  %s313_s18 = int_to_ptr.vmem [resolvable:$true] %s312_s18 }
  0x37   :  { %369 = vmatpush3.msra.mxu0 %v79_v1  ;;  %380 = vmatpush3.msra.mxu1 %v159_v3  ;;  %v234_v9 = vld [vmem:[#allocation8 + $0x18] sm:$0xff]  ;;  %v156_v10 = vld [vmem:[#allocation7] sm:$0xff]  ;;  %v233_v11 = vld [vmem:[#allocation8 + $0x10] sm:$0xff]  ;;  %s572_s19 = smov [#allocation13]   ;;  %s492_s21 = scalar_lea.vmem %s323_s3, 128 }
  0x38   :  { %370 = vmatprep.subr.mxu0 %v568_v0  ;;  %381 = vmatprep.subr.mxu1 %v568_v0  ;;  %v232_v12 = vld [vmem:[#allocation8 + $0x8] sm:$0xff]  ;;  %v231_v13 = vld [vmem:[#allocation8] sm:$0xff]  ;;  %s332_s20 = sshll.u32 %s572_s19, 4  ;;  %p493_p6 = scmp.ne.s32.totalorder %s323_s3, %s492_s21  ;;  %s333_s20 = int_to_ptr.vmem [resolvable:$true] %s332_s20 }
  0x39   :  { %371 = vmatpush3.msra.mxu0 %v78_v2  ;;  %382 = vmatpush3.msra.mxu1 %v158_v5  ;;  %p497_p7 = scmp.lt.s32.totalorder %s323_s3, %s323_s3  ;;  %p498_p8 = scmp.lt.s32.totalorder %s492_s21, %s492_s21 }
  0x3a   :  { %372 = vmatprep.subr.mxu0 %v568_v0  ;;  %383 = vmatprep.subr.mxu1 %v568_v0 }
  0x3b   :  { %373 = vmatpush3.msra.mxu0 %v77_v4  ;;  %384 = vmatpush3.msra.mxu1 %v157_v6  ;;  %p499_p9 = por %p498_p8, %p497_p7 }
  0x3c   :  { %374 = vmatprep.subr.mxu0 %v568_v0  ;;  %385 = vmatprep.subr.mxu1 %v568_v0 }
  0x3d   :  { %375 = vmatpush3.msra.mxu0 %v76_v7  ;;  %386 = vmatpush3.msra.mxu1 %v156_v10  ;;  %p500_p10 = pnand %p499_p9, %p493_p6 }
  0x3e   :  { %377 = vmatmul.mubr.msk.f32.vlgmr.msra.gmra.mxu0 %vm80_vm1, %v75_v8  ;;  %390 = vmatprep.subr.mxu0 %v568_v0 }
  0x3f   :  { %391 = vmatpush3.msra.mxu0 %v234_v9  ;;  %388 = vmatmul.mubr.msk.f32.vlgmr.msra.gmra.mxu1 %vm80_vm1, %v75_v8 }
  0x40   :  { %392 = vmatprep.subr.mxu0 %v568_v0  ;;  %398 = vmatprep.mubr.msk.f32.mxu0 %vm569_vm0, %v568_v0 }
  0x41   :  { %393 = vmatpush3.msra.mxu0 %v233_v11 }
  0x42   :  { %394 = vmatprep.subr.mxu0 %v568_v0 }
  0x43   :  { %395 = vmatpush3.msra.mxu0 %v232_v12 }
  0x44   :  { %396 = vmatprep.subr.mxu0 %v568_v0 }
  0x45   :  { %397 = vmatpush3.msra.mxu0 %v231_v13 }
  0x46   :  { %399 = vmatmul.mubr.msk.f32.vlgmr.msra.gmra.mxu0 %vm80_vm1, %v75_v8 }
  0xfe   :  { %v150_v14 = vpop.f32.mrf.mxu0 }
  0xff   :  { %v154_v15 = vmul.f32 0.17677669, %v150_v14  ;;  %v226_v17 = vpop.f32.mrf.mxu1 }
 0x100   :  { %v378_v16 = vpop.f32.mrf.mxu0  ;;  %230 = vst [vmem:[#allocation11] sm:$0xff] %v226_v17 }
 0x101   :  { %155 = vst [vmem:[#allocation10] sm:$0xff] %v154_v15  ;;  %v389_v18 = vpop.f32.mrf.mxu1 }
 0x102   :  { %503 = shalt.err (!%p500_p10)
}
 0x103   :  { %325 = dma.vmem_to_hbm [thread:$0]  %s323_s3, 128, %s649_s5, [#allocation12]  }
 0x104   :  { %s512_s24 = scalar_lea.vmem %s313_s18, 128  ;;  %p517_p12 = scmp.lt.s32.totalorder %s313_s18, %s313_s18 }
 0x105   :  { %p513_p11 = scmp.ne.s32.totalorder %s313_s18, %s512_s24  ;;  %p518_p13 = scmp.lt.s32.totalorder %s512_s24, %s512_s24 }
 0x107   :  { %p519_p0 = por %p518_p13, %p517_p12 }
 0x109   :  { %p520_p1 = pnand %p519_p0, %p513_p11 }
 0x10b   :  { %523 = shalt.err (!%p520_p1)
}
 0x10c   :  { %315 = dma.vmem_to_hbm [thread:$0]  %s313_s18, 128, %s648_s4, [#allocation4]   ;;  %v301_v19 = vpop.f32.mrf.mxu0 }
 0x10d   :  { %305 = vst [vmem:[#allocation13] sm:$0xff] %v301_v19  ;;  %s532_s27 = scalar_lea.vmem %s333_s20, 128  ;;  %p537_p3 = scmp.lt.s32.totalorder %s333_s20, %s333_s20 }
 0x10e   :  { %v400_v20 = vpop.f32.mrf.mxu0  ;;  %p533_p2 = scmp.ne.s32.totalorder %s333_s20, %s532_s27  ;;  %p538_p4 = scmp.lt.s32.totalorder %s532_s27, %s532_s27 }
 0x110   :  { %p539_p5 = por %p538_p4, %p537_p3 }
 0x112   :  { %p540_p6 = pnand %p539_p5, %p533_p2 }
 0x114   :  { %543 = shalt.err (!%p540_p6)
}
 0x115   :  { %335 = dma.vmem_to_hbm [thread:$0]  %s333_s20, 128, %s650_s6, [#allocation12]  }
 0x116   :  { %558 = dma.done.wait [#allocation4], 128  }
 0x117   :  { %559 = vsyncadd [#allocation4], 4294967168 }
 0x118   :  { %560 = dma.done.wait [#allocation12], 256  }
 0x119   :  { %561 = vsyncadd [#allocation12], 4294967040 }
 0x11a   :  { %345 = vsyncpa [#allocation3], 1 }
 0x11b   :  { %346 = vsyncpa [#allocation6], 1 }
 0x11c   :  { %347 = vsyncpa [#allocation9], 1 }
 0x11d   :  { %348 = vsyncpa [#allocation4], 1 }
 0x11e   :  { %349 = vsyncpa [#allocation12], 1 }

</bundles_post_ra>
